<compile_context>
chip_gen: v6e
topology: v6e:2x2x1
jax: 0.10.0
libtpu: 0.0.40
codegen_flags: <defaults>
</compile_context>

<pallas_src>
import functools

import jax
import jax.numpy as jnp
from jax import lax
from jax.experimental import pallas as pl
from jax.experimental.pallas import tpu as pltpu


def _pair(v):
    if isinstance(v, int):
        return (v, v)
    v = tuple(v)
    if len(v) == 1:
        return (v[0], v[0])
    return (v[0], v[1])


def _same_pads(size, k, s):
    """TF-SAME padding along one axis (matches the PyTorch module's math)."""
    out = -(-size // s)                      # ceil(size / s)
    extra = (out - 1) * s - size + k         # total pad on this axis
    lo = extra // 2
    hi = extra - lo
    return out, lo, hi


def _pick_row_tile(h_out, max_tile=4):
    for t in range(min(h_out, max_tile), 0, -1):
        if h_out % t == 0:
            return t
    return 1


def _maxpool_kernel(x_ref, o_ref, *, KH, KW, SH, SW, TH, W_out, C):
    """One (batch, output-row-tile) per grid step.

    x_ref: (1, Hp, P, SW*C)  zero-padded input with W phase-split by SW
           (free, contiguous reshape done in the wrapper).  Every slice below
           is a static, unstrided slice -> no per-tap gather/relayout.
    o_ref: (1, TH, W_out, C) output row tile (C lane-mapped, full-width store
           per row for lane-dense C).
    """
    t = pl.program_id(1)
    TH_in = (TH - 1) * SH + KH                       # padded rows this tile touches
    row0 = pl.multiple_of(t * (TH * SH), TH * SH)
    xs = x_ref[0, pl.ds(row0, TH_in), :, :]          # (TH_in, P, SW*C)

    # ---- W direction: max over the KW taps via polyphase static slices ----
    m = None
    for kw in range(KW):
        q, s = kw // SW, kw % SW
        piece = xs[:, q:q + W_out, s * C:(s + 1) * C]   # (TH_in, W_out, C)
        m = piece if m is None else jnp.maximum(m, piece)

    # ---- H direction: rows live on an untiled leading axis (cheap selects) --
    for j in range(TH):
        r = m[j * SH]
        for kh in range(1, KH):
            r = jnp.maximum(r, m[j * SH + kh])
        o_ref[0, j, :, :] = r.astype(o_ref.dtype)


def maxpool2d_static_same_padding(x_nchw, kernel_size, stride=None):
    """Forward of MaxPool2dStaticSamePadding.

    x_nchw: (N, C, H, W).  Returns (N, C, ceil(H/sh), ceil(W/sw)), identical to
    F.pad(x, TF-SAME asym, value=0) followed by nn.MaxPool2d(kernel, stride).
    """
    if stride is None:                       # nn.MaxPool2d default: stride = kernel
        stride = kernel_size
    KH, KW = _pair(kernel_size)
    SH, SW = _pair(stride)
    N, C, H, W = x_nchw.shape

    H_out, top, bottom = _same_pads(H, KH, SH)
    W_out, left, right = _same_pads(W, KW, SW)
    # TODO(synk): negative "extra" (kernel < stride) would require cropping
    # (F.pad with negative pads); not supported here.
    assert min(top, bottom, left, right) >= 0

    Hp = H + top + bottom
    Wp = W + left + right
    # Round the padded width up to a multiple of SW so W can be phase-split
    # with a free contiguous reshape; the extra columns are provably never
    # read by any valid (q, s) tap.
    Wp_r = -(-Wp // SW) * SW
    P = Wp_r // SW

    # ---- layout plumbing: NCHW -> NHWC, zero pad like F.pad, phase-split W --
    x = jnp.transpose(x_nchw, (0, 2, 3, 1))
    x = jnp.pad(x, ((0, 0), (top, bottom), (left, right + (Wp_r - Wp)), (0, 0)))
    # TODO(synk): for large feature maps, fold border handling into the kernel
    # (masked taps) instead of materialising a padded HBM copy, and H-tile the
    # input block with a halo to stay within v7x's 64 MiB VMEM.
    x = x.reshape(N, Hp, P, SW * C)

    TH = _pick_row_tile(H_out)
    n_th = H_out // TH

    kernel = functools.partial(_maxpool_kernel, KH=KH, KW=KW, SH=SH, SW=SW,
                               TH=TH, W_out=W_out, C=C)

    out_nhwc = pl.pallas_call(
        kernel,
        out_shape=jax.ShapeDtypeStruct((N, H_out, W_out, C), x_nchw.dtype),
        grid_spec=pltpu.PrefetchScalarGridSpec(
            num_scalar_prefetch=0,
            grid=(N, n_th),
            in_specs=[
                # Full padded image for this batch element; block index does
                # not depend on the row-tile axis.
                pl.BlockSpec((1, Hp, P, SW * C), lambda n, t: (n, 0, 0, 0)),
            ],
            out_specs=pl.BlockSpec((1, TH, W_out, C),
                                   lambda n, t: (n, t, 0, 0)),
        ),
        compiler_params=pltpu.CompilerParams(
            dimension_semantics=("parallel", "parallel")),
    )(x)

    return jnp.transpose(out_nhwc, (0, 3, 1, 2))     # back to NCHW


def _reference(x_nchw, kernel_size, stride=None):
    """Pure-JAX reference: F.pad(zeros, TF-SAME) -> MaxPool2d."""
    if stride is None:
        stride = kernel_size
    KH, KW = _pair(kernel_size)
    SH, SW = _pair(stride)
    _, _, H, W = x_nchw.shape
    _, top, bottom = _same_pads(H, KH, SH)
    _, left, right = _same_pads(W, KW, SW)
    xp = jnp.pad(x_nchw, ((0, 0), (0, 0), (top, bottom), (left, right)))
    return lax.reduce_window(xp, -jnp.inf, lax.max,
                             window_dimensions=(1, 1, KH, KW),
                             window_strides=(1, 1, SH, SW),
                             padding="VALID")


if __name__ == "__main__":
    key = jax.random.PRNGKey(0)
    configs = [
        # (NCHW shape, kernel_size, stride)
        ((2, 128, 16, 16), 3, 2),   # lane-dense channels, asymmetric SAME pad
        ((2, 4, 16, 16), 3, 1),     # stride-1 path, small channel count
        ((1, 4, 15, 13), 2, 2),     # even kernel, odd spatial, asym pad
    ]
    for shape, k, s in configs:
        key, sub = jax.random.split(key)
        x = jax.random.normal(sub, shape, dtype=jnp.float32)
        out = jax.block_until_ready(maxpool2d_static_same_padding(x, k, s))
        ref = _reference(x, k, s)
        assert out.shape == ref.shape, (out.shape, ref.shape)
        assert jnp.allclose(out, ref, atol=0.0, rtol=0.0), \
            float(jnp.max(jnp.abs(out - ref)))
    print("KERNEL_OK")
</pallas_src>

<mosaic_0001>
module attributes {stable_mosaic.version = 11 : i64} {
  func.func @_maxpool_kernel(%arg0: i32, %arg1: i32, %arg2: memref<1x17x9x256xf32, #tpu.memory_space<vmem>>, %arg3: memref<1x4x8x128xf32, #tpu.memory_space<vmem>>) attributes {dimension_semantics = [#tpu.dimension_semantics<parallel>, #tpu.dimension_semantics<parallel>], iteration_bounds = array<i64: 2, 2>, scalar_prefetch = 0 : i64, scratch_operands = 0 : i64, tpu.core_type = #tpu.core_type<tc>, window_params = [{transform_indices = @transform_0, window_bounds = array<i64: 1, 17, 9, 256>}, {transform_indices = @transform_1, window_bounds = array<i64: 1, 4, 8, 128>}]} {
    %c8_i32 = arith.constant 8 : i32
    %0 = arith.muli %arg1, %c8_i32 : i32
    %1 = tpu.assume_multiple %0, 8 : i32
    %c0 = arith.constant 0 : index
    %2 = arith.index_cast %1 : i32 to index
    %c0_0 = arith.constant 0 : index
    %c0_1 = arith.constant 0 : index
    %3 = vector.load %arg2[%c0, %2, %c0_0, %c0_1] : memref<1x17x9x256xf32, #tpu.memory_space<vmem>>, vector<1x9x9x256xf32>
    %4 = vector.shape_cast %3 : vector<1x9x9x256xf32> to vector<9x9x256xf32>
    %5 = vector.extract_strided_slice %4 {offsets = [0, 0, 0], sizes = [9, 8, 128], strides = [1, 1, 1]} : vector<9x9x256xf32> to vector<9x8x128xf32>
    %6 = vector.extract_strided_slice %4 {offsets = [0, 0, 128], sizes = [9, 8, 128], strides = [1, 1, 1]} : vector<9x9x256xf32> to vector<9x8x128xf32>
    %7 = arith.maximumf %5, %6 : vector<9x8x128xf32>
    %8 = vector.extract_strided_slice %4 {offsets = [0, 1, 0], sizes = [9, 8, 128], strides = [1, 1, 1]} : vector<9x9x256xf32> to vector<9x8x128xf32>
    %9 = arith.maximumf %7, %8 : vector<9x8x128xf32>
    %10 = vector.extract_strided_slice %9 {offsets = [0, 0, 0], sizes = [1, 8, 128], strides = [1, 1, 1]} : vector<9x8x128xf32> to vector<1x8x128xf32>
    %11 = vector.shape_cast %10 : vector<1x8x128xf32> to vector<8x128xf32>
    %12 = vector.extract_strided_slice %9 {offsets = [1, 0, 0], sizes = [1, 8, 128], strides = [1, 1, 1]} : vector<9x8x128xf32> to vector<1x8x128xf32>
    %13 = vector.shape_cast %12 : vector<1x8x128xf32> to vector<8x128xf32>
    %14 = arith.maximumf %11, %13 : vector<8x128xf32>
    %15 = vector.extract_strided_slice %9 {offsets = [2, 0, 0], sizes = [1, 8, 128], strides = [1, 1, 1]} : vector<9x8x128xf32> to vector<1x8x128xf32>
    %16 = vector.shape_cast %15 : vector<1x8x128xf32> to vector<8x128xf32>
    %17 = arith.maximumf %14, %16 : vector<8x128xf32>
    %c0_2 = arith.constant 0 : index
    %c0_3 = arith.constant 0 : index
    %c0_4 = arith.constant 0 : index
    %c0_5 = arith.constant 0 : index
    %18 = vector.load %arg3[%c0_2, %c0_3, %c0_4, %c0_5] : memref<1x4x8x128xf32, #tpu.memory_space<vmem>>, vector<1x1x8x128xf32>
    %19 = vector.shape_cast %18 : vector<1x1x8x128xf32> to vector<8x128xf32>
    %20 = vector.shape_cast %17 : vector<8x128xf32> to vector<1x1x8x128xf32>
    tpu.vector_store %arg3[%c0_2, %c0_3, %c0_4, %c0_5], %20 {strides = array<i32>} : memref<1x4x8x128xf32, #tpu.memory_space<vmem>>, vector<1x1x8x128xf32>,
    %21 = vector.extract_strided_slice %9 {offsets = [2, 0, 0], sizes = [1, 8, 128], strides = [1, 1, 1]} : vector<9x8x128xf32> to vector<1x8x128xf32>
    %22 = vector.shape_cast %21 : vector<1x8x128xf32> to vector<8x128xf32>
    %23 = vector.extract_strided_slice %9 {offsets = [3, 0, 0], sizes = [1, 8, 128], strides = [1, 1, 1]} : vector<9x8x128xf32> to vector<1x8x128xf32>
    %24 = vector.shape_cast %23 : vector<1x8x128xf32> to vector<8x128xf32>
    %25 = arith.maximumf %22, %24 : vector<8x128xf32>
    %26 = vector.extract_strided_slice %9 {offsets = [4, 0, 0], sizes = [1, 8, 128], strides = [1, 1, 1]} : vector<9x8x128xf32> to vector<1x8x128xf32>
    %27 = vector.shape_cast %26 : vector<1x8x128xf32> to vector<8x128xf32>
    %28 = arith.maximumf %25, %27 : vector<8x128xf32>
    %c0_6 = arith.constant 0 : index
    %c1 = arith.constant 1 : index
    %c0_7 = arith.constant 0 : index
    %c0_8 = arith.constant 0 : index
    %29 = vector.load %arg3[%c0_6, %c1, %c0_7, %c0_8] : memref<1x4x8x128xf32, #tpu.memory_space<vmem>>, vector<1x1x8x128xf32>
    %30 = vector.shape_cast %29 : vector<1x1x8x128xf32> to vector<8x128xf32>
    %31 = vector.shape_cast %28 : vector<8x128xf32> to vector<1x1x8x128xf32>
    tpu.vector_store %arg3[%c0_6, %c1, %c0_7, %c0_8], %31 {strides = array<i32>} : memref<1x4x8x128xf32, #tpu.memory_space<vmem>>, vector<1x1x8x128xf32>,
    %32 = vector.extract_strided_slice %9 {offsets = [4, 0, 0], sizes = [1, 8, 128], strides = [1, 1, 1]} : vector<9x8x128xf32> to vector<1x8x128xf32>
    %33 = vector.shape_cast %32 : vector<1x8x128xf32> to vector<8x128xf32>
    %34 = vector.extract_strided_slice %9 {offsets = [5, 0, 0], sizes = [1, 8, 128], strides = [1, 1, 1]} : vector<9x8x128xf32> to vector<1x8x128xf32>
    %35 = vector.shape_cast %34 : vector<1x8x128xf32> to vector<8x128xf32>
    %36 = arith.maximumf %33, %35 : vector<8x128xf32>
    %37 = vector.extract_strided_slice %9 {offsets = [6, 0, 0], sizes = [1, 8, 128], strides = [1, 1, 1]} : vector<9x8x128xf32> to vector<1x8x128xf32>
    %38 = vector.shape_cast %37 : vector<1x8x128xf32> to vector<8x128xf32>
    %39 = arith.maximumf %36, %38 : vector<8x128xf32>
    %c0_9 = arith.constant 0 : index
    %c2 = arith.constant 2 : index
    %c0_10 = arith.constant 0 : index
    %c0_11 = arith.constant 0 : index
    %40 = vector.load %arg3[%c0_9, %c2, %c0_10, %c0_11] : memref<1x4x8x128xf32, #tpu.memory_space<vmem>>, vector<1x1x8x128xf32>
    %41 = vector.shape_cast %40 : vector<1x1x8x128xf32> to vector<8x128xf32>
    %42 = vector.shape_cast %39 : vector<8x128xf32> to vector<1x1x8x128xf32>
    tpu.vector_store %arg3[%c0_9, %c2, %c0_10, %c0_11], %42 {strides = array<i32>} : memref<1x4x8x128xf32, #tpu.memory_space<vmem>>, vector<1x1x8x128xf32>,
    %43 = vector.extract_strided_slice %9 {offsets = [6, 0, 0], sizes = [1, 8, 128], strides = [1, 1, 1]} : vector<9x8x128xf32> to vector<1x8x128xf32>
    %44 = vector.shape_cast %43 : vector<1x8x128xf32> to vector<8x128xf32>
    %45 = vector.extract_strided_slice %9 {offsets = [7, 0, 0], sizes = [1, 8, 128], strides = [1, 1, 1]} : vector<9x8x128xf32> to vector<1x8x128xf32>
    %46 = vector.shape_cast %45 : vector<1x8x128xf32> to vector<8x128xf32>
    %47 = arith.maximumf %44, %46 : vector<8x128xf32>
    %48 = vector.extract_strided_slice %9 {offsets = [8, 0, 0], sizes = [1, 8, 128], strides = [1, 1, 1]} : vector<9x8x128xf32> to vector<1x8x128xf32>
    %49 = vector.shape_cast %48 : vector<1x8x128xf32> to vector<8x128xf32>
    %50 = arith.maximumf %47, %49 : vector<8x128xf32>
    %c0_12 = arith.constant 0 : index
    %c3 = arith.constant 3 : index
    %c0_13 = arith.constant 0 : index
    %c0_14 = arith.constant 0 : index
    %51 = vector.load %arg3[%c0_12, %c3, %c0_13, %c0_14] : memref<1x4x8x128xf32, #tpu.memory_space<vmem>>, vector<1x1x8x128xf32>
    %52 = vector.shape_cast %51 : vector<1x1x8x128xf32> to vector<8x128xf32>
    %53 = vector.shape_cast %50 : vector<8x128xf32> to vector<1x1x8x128xf32>
    tpu.vector_store %arg3[%c0_12, %c3, %c0_13, %c0_14], %53 {strides = array<i32>} : memref<1x4x8x128xf32, #tpu.memory_space<vmem>>, vector<1x1x8x128xf32>,
    return
  }
  func.func @transform_0(%arg0: i32, %arg1: i32) -> (i32, i32, i32, i32) {
    %c0_i32 = arith.constant 0 : i32
    %c0_i32_0 = arith.constant 0 : i32
    %c0_i32_1 = arith.constant 0 : i32
    %c0_i32_2 = arith.constant 0 : i32
    return %arg0, %c0_i32, %c0_i32_0, %c0_i32_1 : i32, i32, i32, i32
  }
  func.func @transform_1(%arg0: i32, %arg1: i32) -> (i32, i32, i32, i32) {
    %c0_i32 = arith.constant 0 : i32
    %c0_i32_0 = arith.constant 0 : i32
    %c0_i32_1 = arith.constant 0 : i32
    return %arg0, %arg1, %c0_i32, %c0_i32_0 : i32, i32, i32, i32
  }
}

</mosaic_0001>

<bundles_post_ra>
// kernel: tpu_custom_call.1
= control target key start
LH: loop header
LB: loop body
LE: loop exit
PB: predicated region body
PF: predicated region fallthrough
CT: control target
= control target key end

     0   :  { %6 = vsyncpa [#allocation3], 0  ;;  %s728_s0 = inlined_call_operand.vmem [shape: f32[2,17,9,256], index: 0, kind: input, shape index: {}]   ;;  %s729_s1 = inlined_call_operand.hbm [shape: f32[2,8,8,128], index: 1, kind: output, shape index: {}]  }
   0x1   :  { %8 = vsyncpa [#allocation3 + $0x1], 0  ;;  %s545_s6 = smov 0   ;;  %s547_s7 = smov 0  }
   0x2   :  { %s549_s8 = smov 0   ;;  %s551_s9 = smov 0  }
   0x3   :  { %s553_s10 = smov 0   ;;  %s555_s11 = smov 0  }
   0x4   :  { %s557_s12 = smov 0   ;;  %s559_s13 = smov 0  }
   0x5 LB: > { %s343_s14 = sadd.s32 4294967295, %s530_s13   ;;  %s344_s15 = sadd.s32 4294967294, %s530_s13   ;;  %s530_s13 = sphi %s559_s13, %s14_s13   ;;  %s526_s12 = sphi %s557_s12, %s738_s12   ;;  %s522_s11 = sphi %s555_s11, %s737_s11   ;;  %s518_s10 = sphi %s553_s10, %s736_s10   ;;  %s514_s9 = sphi %s551_s9, %s735_s9   ;;  %s510_s8 = sphi %s549_s8, %s734_s8   ;;  %s506_s7 = sphi %s547_s7, %s733_s7   ;;  %s502_s6 = sphi %s545_s6, %s732_s6  }
   0x6   : > { %s23_s16 = sadd.s32 1, %s522_s11  ;;  %s26_s17 = sadd.s32 1, %s526_s12 }
   0x7   : > { %p24_p0 = scmp.ge.s32.totalorder %s23_s16, 2  ;;  %p71_p1 = scmp.ne.s32.totalorder %s510_s8, %s506_s7 }
   0x8   : > { %p72_p2 = scmp.eq.s32.totalorder %s343_s14, 3  ;;  %p77_p5 = scmp.ne.s32.totalorder %s506_s7, %s502_s6 }
   0x9   : > { %s740_s16 = smov (%p24_p0, %s23_s16), 0  ;;  %s742_s17 = smov (!%p24_p0, %s26_s17), %s526_s12 }
   0xa   : > { %s57_s18 = ssub.s32 %s522_s11, %s740_s16  ;;  %p596_p3 = por %p72_p2, %p71_p1 }
   0xb   : > { %p28_p4 = scmp.ge.s32.totalorder %s742_s17, 2  ;;  %p78_p6 = scmp.eq.s32.totalorder %s344_s15, 3 }
   0xc   : > { %p347_p7 = scmp.ge.s32.totalorder %s530_s13, 1  ;;  %p104_p9 = scmp.lt.s32.totalorder %s530_s13, 5 }
   0xd   : > { %s744_s17 = smov (%p28_p4, %s742_s17), 0  ;;  %p605_p8 = por %p78_p6, %p77_p5 }
   0xe   : > { %s56_s21 = ssub.s32 %s526_s12, %s744_s17  ;;  %s61_s22 = sadd.s32 1, %s510_s8 }
   0xf   : > { %s58_s23 = sor.u32 %s57_s18, %s56_s21  ;;  %p105_p10 = pnand %p347_p7, %p104_p9 }
  0x10   : > { %p59_p11 = scmp.eq.s32.totalorder %s58_s23, 0  ;;  %p124_p12 = scmp.lt.s32.totalorder (!%p105_p10), %s518_s10, 1 }
  0x11   : > { %108 = sbr.rel (%p105_p10) target bundleno = 62 (0x3e), region = 24  ;;  %s363_s27 = sshll.u32 (!%p105_p10), %s514_s9, 8 }
  0x12   : > { %s614_s24 = scalar_select %p59_p11, %s510_s8, %s61_s22  }
  0x13   : > { %s121_s3 = sand.u32 (!%p105_p10), 1, %s506_s7   ;;  %s357_s5 = sshll.u32 (!%p105_p10), %s514_s9, 2 }
  0x14   : > { %s640_s4 = sshll.u32 (!%p105_p10), %s121_s3, 5  ;;  %s358_s14 = sshll.u32 (!%p105_p10), %s518_s10, 3 }
  0x15   : > { %s123_s15 = scalar_lea.vmem (!%p105_p10), [#allocation2], %s640_s4  ;;  %s262_s18 = sadd.s32 (!%p105_p10), %s358_s14, %s357_s5 }
  0x16   : > { %s125_s25 = scalar_select %p124_p12, %s518_s10, 1  ;;  %vm188_vm0 = vcmask 1046528  }
  0x17   : > { %s265_s9 = sshll.u32 %s123_s15, 4  ;;  %s359_s10 = sshll.u32 %s262_s18, 7  ;;  %s668_s9 = int_to_ptr.vmem [resolvable:$true] %s265_s9 }
  0x18   : > { %s364_s26 = smul.u32 544, %s125_s25  ;;  %s673_s23 = scalar_lea.hbm %s729_s1, %s359_s10 }
  0x19   : > { %s677_s25 = scalar_lea.sflag [#allocation3], %s121_s3 }
  0x1a   : > { %s128_s30 = scalar_lea.vmem %s728_s0, %s364_s26  ;;  %s438_s26 = scalar_lea.vmem %s668_s9, 512 }
  0x1b   : > { %s622_s2 = scalar_lea.vmem %s128_s30, %s363_s27  ;;  %p439_p13 = scmp.ne.s32.totalorder %s668_s9, %s438_s26 }
  0x1c   : > { %v134_v0 = vld [vmem:[%s622_s2] sm:$0xff]  ;;  %v135_v1 = vld [vmem:[%s622_s2 + $0x8] sm:$0xff]  ;;  %v136_v2 = vld [vmem:[%s622_s2 + $0x10] sm:$0x1]  ;;  %s532_s27 = smov [#allocation2]  }
  0x1d   : > { %v137_v3 = vld [vmem:[%s622_s2 + $0x20] sm:$0xff]  ;;  %v138_v4 = vld [vmem:[%s622_s2 + $0x28] sm:$0xff]  ;;  %v139_v5 = vld [vmem:[%s622_s2 + $0x30] sm:$0x1]  ;;  %v161_v6 = vmax.f32 %v134_v0, %v135_v1  ;;  %v189_v7 = vrot.slane %v134_v0, 1  ;;  %v190_v8 = vrot.slane %v136_v2, 1  ;;  %p440_p0 = pnand %p439_p13, %p596_p3 }
  0x1e   : > { %v140_v9 = vld [vmem:[%s622_s2 + $0x40] sm:$0xff]  ;;  %v141_v10 = vld [vmem:[%s622_s2 + $0x48] sm:$0xff]  ;;  %v142_v11 = vld [vmem:[%s622_s2 + $0x50] sm:$0x1]  ;;  %v162_v12 = vmax.f32 %v137_v3, %v138_v4  ;;  %v192_v13 = vrot.slane %v137_v3, 1  ;;  %v193_v14 = vrot.slane %v139_v5, 1 }
  0x1f   : > { %v163_v15 = vmax.f32 %v140_v9, %v141_v10  ;;  %v191_v16 = vsel %vm188_vm0, %v189_v7, %v190_v8  ;;  %v195_v17 = vrot.slane %v140_v9, 1  ;;  %v196_v18 = vrot.slane %v142_v11, 1  ;;  %v143_v19 = vld [vmem:[%s622_s2 + $0x60] sm:$0xff]  ;;  %v144_v20 = vld [vmem:[%s622_s2 + $0x68] sm:$0xff]  ;;  %v145_v21 = vld [vmem:[%s622_s2 + $0x70] sm:$0x1]  ;;  %p441_p1 = pneg %p440_p0 }
  0x20   : > { %v194_v22 = vsel %vm188_vm0, %v192_v13, %v193_v14  ;;  %v225_v23 = vmax.f32 %v161_v6, %v191_v16  ;;  %v146_v24 = vld [vmem:[%s622_s2 + $0x80] sm:$0xff]  ;;  %v147_v25 = vld [vmem:[%s622_s2 + $0x88] sm:$0xff]  ;;  %v148_v26 = vld [vmem:[%s622_s2 + $0x90] sm:$0x1]  ;;  %v164_v27 = vmax.f32 %v143_v19, %v144_v20  ;;  %v198_v28 = vrot.slane %v143_v19, 1  ;;  %s442_s28 = sshll.u32 %s532_s27, 4  ;;  %s443_s28 = int_to_ptr.vmem [resolvable:$false] %s442_s28 }
  0x21   : > { %v197_v29 = vsel %vm188_vm0, %v195_v17, %v196_v18  ;;  %v226_v30 = vmax.f32 %v162_v12, %v194_v22  ;;  %v165_v31 = vmax.f32 %v146_v24, %v147_v25  ;;  %v199_v32 = vrot.slane %v145_v21, 1  ;;  %v149_v33 = vld [vmem:[%s622_s2 + $0xa0] sm:$0xff]  ;;  %v150_v34 = vld [vmem:[%s622_s2 + $0xa8] sm:$0xff]  ;;  %v151_v35 = vld [vmem:[%s622_s2 + $0xb0] sm:$0x1]  ;;  %s444_s29 = scalar_lea.vmem %s443_s28, 1024  ;;  %p445_p2 = scmp.lt.s32.totalorder %s668_s9, %s443_s28 }
  0x22   : > { %v227_v36 = vmax.f32 %v163_v15, %v197_v29  ;;  %v201_v37 = vrot.slane %v146_v24, 1  ;;  %v202_v38 = vrot.slane %v148_v26, 1  ;;  %v152_v39 = vld [vmem:[%s622_s2 + $0xc0] sm:$0xff]  ;;  %v153_v40 = vld [vmem:[%s622_s2 + $0xc8] sm:$0xff]  ;;  %v154_v41 = vld [vmem:[%s622_s2 + $0xd0] sm:$0x1]  ;;  %v166_v42 = vmax.f32 %v149_v33, %v150_v34  ;;  %p446_p4 = scmp.lt.s32.totalorder %s444_s29, %s438_s26 }
  0x23   : > { %v234_v43 = vmax.f32 %v225_v23, %v226_v30  ;;  %v200_v44 = vsel %vm188_vm0, %v198_v28, %v199_v32  ;;  %v167_v45 = vmax.f32 %v152_v39, %v153_v40  ;;  %v204_v46 = vrot.slane %v149_v33, 1  ;;  %v155_v47 = vld [vmem:[%s622_s2 + $0xe0] sm:$0xff]  ;;  %v156_v48 = vld [vmem:[%s622_s2 + $0xe8] sm:$0xff]  ;;  %v157_v53 = vld [vmem:[%s622_s2 + $0xf0] sm:$0x1] }
  0x24   : > { %v203_v49 = vsel %vm188_vm0, %v201_v37, %v202_v38  ;;  %v228_v50 = vmax.f32 %v164_v27, %v200_v44  ;;  %v205_v51 = vrot.slane %v151_v35, 1  ;;  %v207_v52 = vrot.slane %v152_v39, 1  ;;  %v158_v54 = vld [vmem:[%s622_s2 + $0x100] sm:$0xff]  ;;  %v159_v55 = vld [vmem:[%s622_s2 + $0x108] sm:$0xff]  ;;  %v160_v59 = vld [vmem:[%s622_s2 + $0x110] sm:$0x1]  ;;  %p447_p5 = por %p446_p4, %p445_p2 }
  0x25   : > { %v235_v56 = vmax.f32 %v234_v43, %v227_v36  ;;  %v229_v57 = vmax.f32 %v165_v31, %v203_v49  ;;  %v208_v58 = vrot.slane %v154_v41, 1  ;;  %v168_v60 = vmax.f32 %v155_v47, %v156_v48 }
  0x26   : > { %v237_v61 = vmax.f32 %v227_v36, %v228_v50  ;;  %v206_v62 = vsel %vm188_vm0, %v204_v46, %v205_v51  ;;  %v169_v63 = vmax.f32 %v158_v54, %v159_v55  ;;  %v210_v0 = vrot.slane %v155_v47, 1  ;;  %p448_p6 = pnand %p447_p5, %p441_p1 }
  0x27   : > { %236 = vst [vmem:[%s123_s15] sm:$0xff] %v235_v56  ;;  %v209_v1 = vsel %vm188_vm0, %v207_v52, %v208_v58  ;;  %v230_v2 = vmax.f32 %v166_v42, %v206_v62  ;;  %v211_v3 = vrot.slane %v157_v53, 1  ;;  %v213_v4 = vrot.slane %v158_v54, 1 }
  0x28   : > { %v238_v5 = vmax.f32 %v237_v61, %v229_v57  ;;  %v231_v6 = vmax.f32 %v167_v45, %v209_v1  ;;  %v214_v7 = vrot.slane %v160_v59, 1 }
  0x29   : > { %v241_v8 = vmax.f32 %v229_v57, %v230_v2  ;;  %v212_v9 = vsel %vm188_vm0, %v210_v0, %v211_v3 }
  0x2a   : > { %353 = vst [vmem:[%s123_s15 + $0x8] sm:$0xff] %v238_v5  ;;  %v215_v10 = vsel %vm188_vm0, %v213_v4, %v214_v7  ;;  %v232_v11 = vmax.f32 %v168_v60, %v212_v9 }
  0x2b   : > { %v242_v12 = vmax.f32 %v241_v8, %v231_v6  ;;  %v233_v13 = vmax.f32 %v169_v63, %v215_v10 }
  0x2c   : > { %v245_v14 = vmax.f32 %v231_v6, %v232_v11 }
  0x2d   : > { %354 = vst [vmem:[%s123_s15 + $0x10] sm:$0xff] %v242_v12 }
  0x2e   : > { %v246_v15 = vmax.f32 %v245_v14, %v233_v13 }
  0x30   : > { %355 = vst [vmem:[%s123_s15 + $0x18] sm:$0xff] %v246_v15 }
  0x31   : > { %451 = shalt.err (!%p448_p6)
}
  0x32   : > { %s452_s30 = scalar_lea.hbm %s673_s23, 512  ;;  %s456_s4 = scalar_lea.hbm %s729_s1, 2048 }
  0x33   : > { %p453_p7 = scmp.ne.s32.totalorder %s673_s23, %s452_s30  ;;  %p457_p11 = scmp.lt.s32.totalorder %s673_s23, %s729_s1 }
  0x34   : > { %p458_p12 = scmp.lt.s32.totalorder %s456_s4, %s452_s30 }
  0x35   : > { %p454_p9 = pnand %p453_p7, %p596_p3 }
  0x36   : > { %p459_p13 = por %p458_p12, %p457_p11 }
  0x37   : > { %p455_p10 = pneg %p454_p9 }
  0x39   : > { %p460_p0 = pnand %p459_p13, %p455_p10 }
  0x3b   : > { %463 = shalt.err (!%p460_p0)
}
  0x3c   : > { %s533_s15 = smov 128   ;;  %s534_s18 = smov 8  }
  0x3d   : > { %365 = dma.vmem_to_hbm [thread:$0]  (%p596_p3), %s668_s9, 512, %s673_s23, %s677_s25, %s533_s15, %s533_s15, %s534_s18  }
  0x3e PF: > { %p371_p1 = scmp.ge.s32.totalorder %s530_s13, 2  ;;  %s280_s10 = sand.u32 1, %s502_s6  }
  0x3f   : > { %s281_s21 = scalar_lea.sflag [#allocation3], %s280_s10 }
  0x40   : > { %p368_p2 = pnand %p371_p1, %p605_p8 }
  0x42   : > { %p369_p4 = pneg %p368_p2 }
  0x44   : > { %497 = dma.done.wait (%p369_p4), %s281_s21, 512  }
  0x45   : > { %499 = vsyncadd (%p369_p4), %s281_s21, 4294966784  ;;  %s14_s13 = sadd.s32 1, %s530_s13   ;;  %s732_s6 = smov %s506_s7 }
  0x46   : > { %p11_p5 = scmp.ge.s32.totalorder %s14_s13, 6   ;;  %s733_s7 = smov %s510_s8 }
  0x47   : > { %s734_s8 = smov %s614_s24  ;;  %s735_s9 = smov %s522_s11 }
  0x48   : > { %s736_s10 = smov %s526_s12  ;;  %s737_s11 = smov %s740_s16 }
  0x49   : > { %s738_s12 = smov %s744_s17  ;;  %13 = sbr.rel (!%p11_p5) target bundleno = 5 (0x5), region = 63 }
  0x4e   :  { %286 = vsyncpa [#allocation3], 1 }
  0x4f   :  { %288 = vsyncpa [#allocation3 + $0x1], 1 }

</bundles_post_ra>
